<compile_context>
chip_gen: v6e
topology: v6e:2x2x1
jax: 0.10.0
libtpu: 0.0.40
codegen_flags: <defaults>
</compile_context>

<pallas_src>
import functools

import jax
import jax.numpy as jnp
from jax.experimental import pallas as pl
from jax.experimental.pallas import tpu as pltpu

_LANES = 128        # vreg lane width; output padded to a multiple of this
_SUBLANES = 8       # fp32 sublane count; batch tiles are multiples of this
_STRIP = 128        # rows per in-kernel strip (bounds vreg live ranges)


def _round_up(x, m):
    return -(-x // m) * m


def _tpu_device_kind():
    try:
        return jax.devices()[0].device_kind.lower()
    except Exception:  # pragma: no cover - backend not initialized
        return ""


_DEVICE_KIND = _tpu_device_kind()
_IS_V7X = ("v7" in _DEVICE_KIND) or ("7x" in _DEVICE_KIND)
# v7x: smaller tiles + CORE_PARALLEL so both TensorCores split replay batches.
# v5e/v6e: single TC -> fat tiles amortize the ~0.35us per-grid-step cost.
_MAX_BATCH_TILE = 128 if _IS_V7X else 512


def dqn_kernel(x_ref, w1_ref, b1_ref, w2_ref, b2_ref, q_ref, a_ref, *,
               n_actions, strip, n_strips):
    """q = relu(x @ W1 + b1) @ W2_pad + b2_pad ; a = argmax(q[:, :n_actions]).

    dropout = identity (eval mode).  W2/b2 arrive pre-padded to a lane-dense
    width; padded columns are zero and excluded from the argmax.
    """
    w1 = w1_ref[...].astype(jnp.float32)      # (n_obs, hidden)
    b1 = b1_ref[...].astype(jnp.float32)      # (1, hidden)
    w2 = w2_ref[...]                          # (hidden, out_w)  fp32 or bf16
    b2 = b2_ref[...].astype(jnp.float32)      # (1, out_w)
    n_obs = w1.shape[0]
    out_w = w2.shape[1]

    def strip_body(r0):
        x = x_ref[pl.ds(r0, strip), :].astype(jnp.float32)    # (strip, n_obs)

        if n_obs < 8:
            # K tiny (CartPole: 4): keep fc1 off the MXU — a few VPU
            # broadcast-FMAs, unrolled at trace time.
            h = x[:, 0:1] * w1[0:1, :] + b1
            for k in range(1, n_obs):
                h = h + x[:, k:k + 1] * w1[k:k + 1, :]
        else:
            h = jnp.dot(x, w1, preferred_element_type=jnp.float32) + b1

        h = jnp.maximum(h, 0.0)               # ReLU; dropout(eval) = identity

        # fc2 on the MXU: lane-dense (strip, out_w), fp32 accumulation.
        q = jnp.dot(h.astype(w2.dtype), w2,
                    preferred_element_type=jnp.float32) + b2
        q_ref[pl.ds(r0, strip), :] = q.astype(q_ref.dtype)

        # Fused greedy action over the real (unpadded) action columns.
        # Implemented with max/min reductions (first-occurrence tie-break).
        col = jax.lax.broadcasted_iota(jnp.int32, q.shape, 1)
        valid = col < n_actions
        q_valid = jnp.where(valid, q, -jnp.inf)
        q_max = jnp.max(q_valid, axis=-1, keepdims=True)
        idx = jnp.where((q_valid == q_max) & valid, col, out_w)
        act = jnp.min(idx, axis=-1, keepdims=True).astype(jnp.int32)
        a_ref[pl.ds(r0, strip), :] = act

    if n_strips == 1:
        strip_body(0)
    else:
        def body(s, carry):
            strip_body(pl.multiple_of(s * strip, strip))
            return carry
        jax.lax.fori_loop(0, n_strips, body, 0, unroll=True)


def prepare_params(w1, b1, w2, b2, *, out_lanes=_LANES, fc2_dtype=jnp.float32):
    """One-time parameter prep, hoisted off the per-env-step forward path.

    Pads W2/b2 columns to a lane-dense width, reshapes biases to 2-D, and
    optionally casts W2 to bf16 (native MXU operand rate on v6e/v7x).
    Returns (w1, b1_2d, w2_padded, b2_padded, n_actions).
    """
    hidden = w1.shape[1]
    n_actions = w2.shape[1]
    out_w = _round_up(max(n_actions, out_lanes), out_lanes)
    pad = out_w - n_actions
    w1_p = w1.astype(jnp.float32)
    b1_p = jnp.reshape(b1, (1, hidden)).astype(jnp.float32)
    w2_p = jnp.pad(w2, ((0, 0), (0, pad))).astype(fc2_dtype)
    b2_p = jnp.pad(jnp.reshape(b2, (1, n_actions)),
                   ((0, 0), (0, pad))).astype(jnp.float32)
    return w1_p, b1_p, w2_p, b2_p, n_actions


@functools.partial(jax.jit, static_argnames=("n_actions", "return_greedy_action"))
def dqn_forward(x, w1, b1, w2, b2, *, n_actions, return_greedy_action=False):
    """DQN_network forward.  x: (batch, n_obs) -> q: (batch, n_actions).

    `w1, b1, w2, b2` must come from prepare_params() (pre-padded, 2-D biases).
    With return_greedy_action=True also returns argmax_a q (int32, (batch,)).
    """
    batch, n_obs = x.shape
    hidden = w1.shape[1]
    out_w = w2.shape[1]

    # --- batch tiling: fat tiles, ragged batches zero-padded (no assert) ----
    padded_batch = _round_up(max(batch, _SUBLANES), _SUBLANES)
    if padded_batch <= _MAX_BATCH_TILE:
        if padded_batch > _STRIP:
            padded_batch = _round_up(padded_batch, _STRIP)
        batch_tile = padded_batch
    else:
        batch_tile = _MAX_BATCH_TILE
        # On v7x keep the grid length even so CORE_PARALLEL splits evenly.
        quantum = 2 * batch_tile if _IS_V7X else batch_tile
        padded_batch = _round_up(padded_batch, quantum)
    if padded_batch != batch:
        x = jnp.pad(x, ((0, padded_batch - batch), (0, 0)))

    strip = min(batch_tile, _STRIP)
    n_strips = batch_tile // strip
    grid = (padded_batch // batch_tile,)

    if _IS_V7X and grid[0] >= 2:
        # Only core_parallel actually changes codegen / uses both v7x TCs.
        dim_sem = (pltpu.CORE_PARALLEL,)
    else:
        dim_sem = ("parallel",)

    # Advisory cost: real n_actions / useful output bytes (not the padded 128).
    flops = 2 * padded_batch * (n_obs * hidden + hidden * n_actions)
    bytes_accessed = (x.dtype.itemsize * padded_batch * n_obs
                      + w1.dtype.itemsize * n_obs * hidden
                      + b1.dtype.itemsize * hidden
                      + w2.dtype.itemsize * hidden * n_actions
                      + b2.dtype.itemsize * n_actions
                      + 4 * padded_batch * n_actions     # q output (useful)
                      + 4 * padded_batch)                # greedy-action output

    kernel = functools.partial(dqn_kernel, n_actions=n_actions,
                               strip=strip, n_strips=n_strips)

    q_pad, act_pad = pl.pallas_call(
        kernel,
        out_shape=(jax.ShapeDtypeStruct((padded_batch, out_w), jnp.float32),
                   jax.ShapeDtypeStruct((padded_batch, 1), jnp.int32)),
        grid_spec=pltpu.PrefetchScalarGridSpec(
            num_scalar_prefetch=0,
            grid=grid,
            in_specs=[
                pl.BlockSpec((batch_tile, n_obs), lambda i: (i, 0)),   # x tile
                # Constant index_maps: weights/biases stay VMEM-resident
                # across grid steps (no re-DMA).
                pl.BlockSpec((n_obs, hidden), lambda i: (0, 0)),       # W1
                pl.BlockSpec((1, hidden), lambda i: (0, 0)),           # b1
                pl.BlockSpec((hidden, out_w), lambda i: (0, 0)),       # W2 (pre-padded)
                pl.BlockSpec((1, out_w), lambda i: (0, 0)),            # b2 (pre-padded)
            ],
            out_specs=[
                pl.BlockSpec((batch_tile, out_w), lambda i: (i, 0)),   # q (lane-dense)
                pl.BlockSpec((batch_tile, 1), lambda i: (i, 0)),       # greedy action
            ],
        ),
        compiler_params=pltpu.CompilerParams(dimension_semantics=dim_sem),
        cost_estimate=pl.CostEstimate(flops=flops, transcendentals=0,
                                      bytes_accessed=bytes_accessed),
    )(x, w1, b1, w2, b2)

    q = q_pad[:batch, :n_actions]
    if return_greedy_action:
        return q, act_pad[:batch, 0]
    return q


def init_params(key, n_observations, hidden_size, n_actions):
    """Deterministic init mimicking torch.nn.Linear default (U[-1/sqrt(fan_in), +])."""
    k1, k2, k3, k4 = jax.random.split(key, 4)
    bound1 = 1.0 / jnp.sqrt(jnp.float32(n_observations))
    bound2 = 1.0 / jnp.sqrt(jnp.float32(hidden_size))
    # Stored as (in, out), i.e. transpose of PyTorch's (out, in) weight layout.
    w1 = jax.random.uniform(k1, (n_observations, hidden_size), jnp.float32,
                            -bound1, bound1)
    b1 = jax.random.uniform(k2, (hidden_size,), jnp.float32, -bound1, bound1)
    w2 = jax.random.uniform(k3, (hidden_size, n_actions), jnp.float32,
                            -bound2, bound2)
    b2 = jax.random.uniform(k4, (n_actions,), jnp.float32, -bound2, bound2)
    return w1, b1, w2, b2


if __name__ == "__main__":
    # CartPole-like sizes: 4 observations, 2 actions, hidden=128, batch=8.
    n_observations, hidden_size, n_actions = 4, 128, 2
    batch = 8

    key = jax.random.PRNGKey(0)
    kx, kp = jax.random.split(key)
    x = jax.random.normal(kx, (batch, n_observations), dtype=jnp.float32)
    w1, b1, w2, b2 = init_params(kp, n_observations, hidden_size, n_actions)

    # One-time parameter prep (hoisted out of the per-step forward path).
    p_w1, p_b1, p_w2, p_b2, n_act = prepare_params(w1, b1, w2, b2)

    # Small inference batch (grid=(1,)), with the fused greedy-action output.
    q, act = dqn_forward(x, p_w1, p_b1, p_w2, p_b2,
                         n_actions=n_act, return_greedy_action=True)
    jax.block_until_ready((q, act))

    # Pure-JAX reference check (eval-mode dropout == identity).
    q_ref = jnp.maximum(x @ w1 + b1, 0.0) @ w2 + b2
    assert q.shape == (batch, n_actions)
    assert jnp.allclose(q, q_ref, atol=1e-5, rtol=1e-5)
    assert act.shape == (batch,)
    assert jnp.array_equal(act, jnp.argmax(q, axis=-1).astype(jnp.int32))

    # Ragged replay-buffer-style batch: exercises padding + multi-strip/tile path.
    x_big = jax.random.normal(kx, (300, n_observations), dtype=jnp.float32)
    q_big = dqn_forward(x_big, p_w1, p_b1, p_w2, p_b2, n_actions=n_act)
    jax.block_until_ready(q_big)
    q_big_ref = jnp.maximum(x_big @ w1 + b1, 0.0) @ w2 + b2
    assert q_big.shape == (300, n_actions)
    assert jnp.allclose(q_big, q_big_ref, atol=1e-5, rtol=1e-5)

    # Optional bf16-operand fc2 (native MXU rate on v6e/v7x), fp32 accumulation.
    b_w1, b_b1, b_w2, b_b2, _ = prepare_params(w1, b1, w2, b2,
                                               fc2_dtype=jnp.bfloat16)
    q_bf = dqn_forward(x_big, b_w1, b_b1, b_w2, b_b2, n_actions=n_act)
    jax.block_until_ready(q_bf)
    assert jnp.allclose(q_bf, q_big_ref, atol=3e-2, rtol=3e-2)

    print("KERNEL_OK")
</pallas_src>

<mosaic_0001>
module attributes {stable_mosaic.version = 11 : i64} {
  func.func @dqn_kernel(%arg0: i32, %arg1: memref<8x4xf32, #tpu.memory_space<vmem>>, %arg2: memref<4x128xf32, #tpu.memory_space<vmem>>, %arg3: memref<1x128xf32, #tpu.memory_space<vmem>>, %arg4: memref<128x128xf32, #tpu.memory_space<vmem>>, %arg5: memref<1x128xf32, #tpu.memory_space<vmem>>, %arg6: memref<8x128xf32, #tpu.memory_space<vmem>>, %arg7: memref<8x1xi32, #tpu.memory_space<vmem>>) attributes {dimension_semantics = [#tpu.dimension_semantics<parallel>], iteration_bounds = array<i64: 1>, scalar_prefetch = 0 : i64, scratch_operands = 0 : i64, tpu.core_type = #tpu.core_type<tc>, window_params = [{transform_indices = @transform_0, window_bounds = array<i64: 8, 4>}, {pipeline_mode = #tpu.pipeline_mode<synchronous>, transform_indices = @transform_1, window_bounds = array<i64: 4, 128>}, {pipeline_mode = #tpu.pipeline_mode<synchronous>, transform_indices = @transform_2, window_bounds = array<i64: 1, 128>}, {pipeline_mode = #tpu.pipeline_mode<synchronous>, transform_indices = @transform_3, window_bounds = array<i64: 128, 128>}, {pipeline_mode = #tpu.pipeline_mode<synchronous>, transform_indices = @transform_4, window_bounds = array<i64: 1, 128>}, {transform_indices = @transform_5, window_bounds = array<i64: 8, 128>}, {transform_indices = @transform_6, window_bounds = array<i64: 8, 1>}]} {
    %c0 = arith.constant 0 : index
    %c0_0 = arith.constant 0 : index
    %0 = vector.load %arg2[%c0, %c0_0] : memref<4x128xf32, #tpu.memory_space<vmem>>, vector<4x128xf32>
    %c0_1 = arith.constant 0 : index
    %c0_2 = arith.constant 0 : index
    %1 = vector.load %arg3[%c0_1, %c0_2] : memref<1x128xf32, #tpu.memory_space<vmem>>, vector<1x128xf32>
    %c0_3 = arith.constant 0 : index
    %c0_4 = arith.constant 0 : index
    %2 = vector.load %arg4[%c0_3, %c0_4] : memref<128x128xf32, #tpu.memory_space<vmem>>, vector<128x128xf32>
    %c0_5 = arith.constant 0 : index
    %c0_6 = arith.constant 0 : index
    %3 = vector.load %arg5[%c0_5, %c0_6] : memref<1x128xf32, #tpu.memory_space<vmem>>, vector<1x128xf32>
    %c0_7 = arith.constant 0 : index
    %c0_8 = arith.constant 0 : index
    %4 = vector.load %arg1[%c0_7, %c0_8] : memref<8x4xf32, #tpu.memory_space<vmem>>, vector<8x4xf32>
    %5 = vector.extract_strided_slice %4 {offsets = [0, 0], sizes = [8, 1], strides = [1, 1]} : vector<8x4xf32> to vector<8x1xf32>
    %6 = vector.extract_strided_slice %0 {offsets = [0, 0], sizes = [1, 128], strides = [1, 1]} : vector<4x128xf32> to vector<1x128xf32>
    %7 = vector.broadcast %5 : vector<8x1xf32> to vector<8x128xf32>
    %8 = vector.broadcast %6 : vector<1x128xf32> to vector<8x128xf32>
    %9 = arith.mulf %7, %8 : vector<8x128xf32>
    %10 = vector.broadcast %1 : vector<1x128xf32> to vector<8x128xf32>
    %11 = arith.addf %9, %10 : vector<8x128xf32>
    %12 = vector.extract_strided_slice %4 {offsets = [0, 1], sizes = [8, 1], strides = [1, 1]} : vector<8x4xf32> to vector<8x1xf32>
    %13 = vector.extract_strided_slice %0 {offsets = [1, 0], sizes = [1, 128], strides = [1, 1]} : vector<4x128xf32> to vector<1x128xf32>
    %14 = vector.broadcast %12 : vector<8x1xf32> to vector<8x128xf32>
    %15 = vector.broadcast %13 : vector<1x128xf32> to vector<8x128xf32>
    %16 = arith.mulf %14, %15 : vector<8x128xf32>
    %17 = arith.addf %11, %16 : vector<8x128xf32>
    %18 = vector.extract_strided_slice %4 {offsets = [0, 2], sizes = [8, 1], strides = [1, 1]} : vector<8x4xf32> to vector<8x1xf32>
    %19 = vector.extract_strided_slice %0 {offsets = [2, 0], sizes = [1, 128], strides = [1, 1]} : vector<4x128xf32> to vector<1x128xf32>
    %20 = vector.broadcast %18 : vector<8x1xf32> to vector<8x128xf32>
    %21 = vector.broadcast %19 : vector<1x128xf32> to vector<8x128xf32>
    %22 = arith.mulf %20, %21 : vector<8x128xf32>
    %23 = arith.addf %17, %22 : vector<8x128xf32>
    %24 = vector.extract_strided_slice %4 {offsets = [0, 3], sizes = [8, 1], strides = [1, 1]} : vector<8x4xf32> to vector<8x1xf32>
    %25 = vector.extract_strided_slice %0 {offsets = [3, 0], sizes = [1, 128], strides = [1, 1]} : vector<4x128xf32> to vector<1x128xf32>
    %26 = vector.broadcast %24 : vector<8x1xf32> to vector<8x128xf32>
    %27 = vector.broadcast %25 : vector<1x128xf32> to vector<8x128xf32>
    %28 = arith.mulf %26, %27 : vector<8x128xf32>
    %29 = arith.addf %23, %28 : vector<8x128xf32>
    %cst = arith.constant 0.000000e+00 : f32
    %30 = vector.broadcast %cst : f32 to vector<8x128xf32>
    %31 = arith.maximumf %29, %30 : vector<8x128xf32>
    %cst_9 = arith.constant dense<0.000000e+00> : vector<8x128xf32>
    %32 = tpu.matmul %31, %2, %cst_9 {dimension_numbers = #tpu.dot_dimension_numbers<[1], [0], [0], [1], [0, 0, 1, 1], [], []>} : vector<8x128xf32>, vector<128x128xf32>, vector<8x128xf32> -> vector<8x128xf32>
    %33 = vector.broadcast %3 : vector<1x128xf32> to vector<8x128xf32>
    %34 = arith.addf %32, %33 : vector<8x128xf32>
    %c0_10 = arith.constant 0 : index
    %c0_11 = arith.constant 0 : index
    %35 = vector.load %arg6[%c0_10, %c0_11] : memref<8x128xf32, #tpu.memory_space<vmem>>, vector<8x128xf32>
    tpu.vector_store %arg6[%c0_10, %c0_11], %34 {strides = array<i32>} : memref<8x128xf32, #tpu.memory_space<vmem>>, vector<8x128xf32>,
    %36 = tpu.iota {dimensions = array<i32: 1>} : vector<8x128xi32>
    %c2_i32 = arith.constant 2 : i32
    %37 = vector.broadcast %c2_i32 : i32 to vector<8x128xi32>
    %38 = arith.cmpi slt, %36, %37 : vector<8x128xi32>
    %cst_12 = arith.constant 0xFF800000 : f32
    %39 = vector.broadcast %cst_12 : f32 to vector<8x128xf32>
    %40 = arith.select %38, %34, %39 : vector<8x128xi1>, vector<8x128xf32>
    %cst_13 = arith.constant dense<0xFF800000> : vector<8xf32>
    %41 = vector.multi_reduction <maximumf>, %40, %cst_13 [1] : vector<8x128xf32> to vector<8xf32>
    %42 = vector.shape_cast %41 : vector<8xf32> to vector<8x1xf32>
    %43 = vector.broadcast %42 : vector<8x1xf32> to vector<8x128xf32>
    %44 = arith.cmpf oeq, %40, %43 : vector<8x128xf32>
    %45 = arith.andi %44, %38 : vector<8x128xi1>
    %c128_i32 = arith.constant 128 : i32
    %46 = vector.broadcast %c128_i32 : i32 to vector<8x128xi32>
    %47 = arith.select %45, %36, %46 : vector<8x128xi1>, vector<8x128xi32>
    %cst_14 = arith.constant dense<2147483647> : vector<8xi32>
    %48 = vector.multi_reduction <minsi>, %47, %cst_14 [1] : vector<8x128xi32> to vector<8xi32>
    %49 = vector.shape_cast %48 : vector<8xi32> to vector<8x1xi32>
    %c0_15 = arith.constant 0 : index
    %c0_16 = arith.constant 0 : index
    %50 = vector.load %arg7[%c0_15, %c0_16] : memref<8x1xi32, #tpu.memory_space<vmem>>, vector<8x1xi32>
    tpu.vector_store %arg7[%c0_15, %c0_16], %49 {strides = array<i32>} : memref<8x1xi32, #tpu.memory_space<vmem>>, vector<8x1xi32>,
    return
  }
  func.func @transform_0(%arg0: i32) -> (i32, i32) {
    %c0_i32 = arith.constant 0 : i32
    %c0_i32_0 = arith.constant 0 : i32
    return %arg0, %c0_i32 : i32, i32
  }
  func.func @transform_1(%arg0: i32) -> (i32, i32) {
    %c0_i32 = arith.constant 0 : i32
    %c0_i32_0 = arith.constant 0 : i32
    %c0_i32_1 = arith.constant 0 : i32
    return %c0_i32, %c0_i32_0 : i32, i32
  }
  func.func @transform_2(%arg0: i32) -> (i32, i32) {
    %c0_i32 = arith.constant 0 : i32
    %c0_i32_0 = arith.constant 0 : i32
    %c0_i32_1 = arith.constant 0 : i32
    return %c0_i32, %c0_i32_0 : i32, i32
  }
  func.func @transform_3(%arg0: i32) -> (i32, i32) {
    %c0_i32 = arith.constant 0 : i32
    %c0_i32_0 = arith.constant 0 : i32
    %c0_i32_1 = arith.constant 0 : i32
    return %c0_i32, %c0_i32_0 : i32, i32
  }
  func.func @transform_4(%arg0: i32) -> (i32, i32) {
    %c0_i32 = arith.constant 0 : i32
    %c0_i32_0 = arith.constant 0 : i32
    %c0_i32_1 = arith.constant 0 : i32
    return %c0_i32, %c0_i32_0 : i32, i32
  }
  func.func @transform_5(%arg0: i32) -> (i32, i32) {
    %c0_i32 = arith.constant 0 : i32
    %c0_i32_0 = arith.constant 0 : i32
    return %arg0, %c0_i32 : i32, i32
  }
  func.func @transform_6(%arg0: i32) -> (i32, i32) {
    %c0_i32 = arith.constant 0 : i32
    %c0_i32_0 = arith.constant 0 : i32
    return %arg0, %c0_i32 : i32, i32
  }
}

</mosaic_0001>

<bundles_post_ra>
// kernel: dqn_forward.1
= control target key start
LH: loop header
LB: loop body
LE: loop exit
PB: predicated region body
PF: predicated region fallthrough
CT: control target
= control target key end

     0   :  { %12 = vsyncpa [#allocation3], 0  ;;  %s305_s21 = smov [#allocation2]   ;;  %s370_s0 = inlined_call_operand.vmem [shape: f32[8,4], index: 0, kind: input, shape index: {}]   ;;  %s371_s1 = inlined_call_operand.vmem [shape: f32[4,128], index: 1, kind: input, shape index: {}]   ;;  %s372_s2 = inlined_call_operand.vmem [shape: f32[1,128], index: 2, kind: input, shape index: {}]   ;;  %s373_s3 = inlined_call_operand.hbm [shape: f32[128,128], index: 3, kind: input, shape index: {}]   ;;  %s374_s4 = inlined_call_operand.vmem [shape: f32[1,128], index: 4, kind: input, shape index: {}]   ;;  %s375_s5 = inlined_call_operand.vmem [shape: f32[8,128], index: 5, kind: output, shape index: {0}]   ;;  %s376_s6 = inlined_call_operand.vmem [shape: s32[8,1], index: 6, kind: output, shape index: {1}]  }
   0x1   :  { %s24_s22 = sshll.u32 %s305_s21, 4  ;;  %s25_s22 = int_to_ptr.vmem [resolvable:$true] %s24_s22 }
   0x2   :  { %s291_s23 = scalar_lea.vmem %s25_s22, 2048  ;;  %p296_p1 = scmp.lt.s32.totalorder %s25_s22, %s25_s22 }
   0x3   :  { %p292_p0 = scmp.ne.s32.totalorder %s25_s22, %s291_s23  ;;  %p297_p2 = scmp.lt.s32.totalorder %s291_s23, %s291_s23 }
   0x5   :  { %p298_p3 = por %p297_p2, %p296_p1 }
   0x7   :  { %p299_p4 = pnand %p298_p3, %p292_p0 }
   0x9   :  { %302 = shalt.err (!%p299_p4)
}
   0xa   :  { %s306_s24 = smov 128   ;;  %s307_s25 = smov 8  }
   0xb   :  { %30 = dma.hbm_to_vmem [thread:$0]  %s373_s3, 2048, %s25_s22, [#allocation3], %s306_s24, %s306_s24, %s307_s25  }
   0xc   :  { %303 = dma.done.wait [#allocation3], 2048  }
   0xd   :  { %304 = vsyncadd [#allocation3], 4294965248  ;;  %v308_v0 = vmov 0   ;;  %v309_v1 = vmov 2   ;;  %v310_v2 = vmov 0.0   ;;  %v55_v3 = vld [vmem:[%s370_s0] sm:$0xff]  ;;  %v61_v22 = vlaneseq }
   0xe   :  { %278 = vset.pattern.permute.xlu0 %v308_v0  ;;  %280 = vset.pattern.permute.xlu1 %v309_v1  ;;  %v53_v4 = vld [vmem:[#allocation2 + $0x78] sm:$0xff]  ;;  %v52_v5 = vld [vmem:[#allocation2 + $0x70] sm:$0xff]  ;;  %v311_v6 = vmov 1   ;;  %v312_v7 = vmov 3   ;;  %v51_v8 = vld [vmem:[#allocation2 + $0x68] sm:$0xff]  ;;  %vm313_vm0 = vmmov 0  }
   0xf   :  { %234 = vmatprep.subr.mxu0 %v310_v2  ;;  %58 = vperm.xlu0 %278, %v55_v3   ;;  %v50_v9 = vld [vmem:[#allocation2 + $0x60] sm:$0xff]  ;;  %v49_v10 = vld [vmem:[#allocation2 + $0x58] sm:$0xff]  ;;  %v48_v11 = vld [vmem:[#allocation2 + $0x50] sm:$0xff]  ;;  %v62_v23 = vshrl.u32 %v61_v22, 7  ;;  %v182_v47 = vand.u32 127, %v61_v22  ;;  %vm204_vm5 = vcmask 7168  }
  0x10   :  { %84 = vperm.xlu1 %280, %v55_v3   ;;  %235 = vmatpush3.msra.mxu0 %v53_v4  ;;  %v47_v12 = vld [vmem:[#allocation2 + $0x48] sm:$0xff]  ;;  %v46_v13 = vld [vmem:[#allocation2 + $0x40] sm:$0xff]  ;;  %v45_v14 = vld [vmem:[#allocation2 + $0x38] sm:$0xff] }
  0x11   :  { %236 = vmatprep.subr.mxu0 %v310_v2  ;;  %266 = vmatprep.mubr.msk.f32.mxu0 %vm313_vm0, %v310_v2  ;;  %v44_v15 = vld [vmem:[#allocation2 + $0x30] sm:$0xff]  ;;  %v43_v16 = vld [vmem:[#allocation2 + $0x28] sm:$0xff]  ;;  %v42_v17 = vld [vmem:[#allocation2 + $0x20] sm:$0xff]  ;;  %v63_v24 = vsub.s32 0, %v62_v23  ;;  %v79_v27 = vsub.s32 1, %v62_v23  ;;  %v89_v29 = vsub.s32 2, %v62_v23 }
  0x12   :  { %237 = vmatpush3.msra.mxu0 %v52_v5  ;;  %v41_v18 = vld [vmem:[#allocation2 + $0x18] sm:$0xff]  ;;  %v40_v19 = vld [vmem:[#allocation2 + $0x10] sm:$0xff]  ;;  %v39_v20 = vld [vmem:[#allocation2 + $0x8] sm:$0xff]  ;;  %v99_v31 = vsub.s32 3, %v62_v23  ;;  %vm183_vm1 = vcmp.lt.s32.totalorder %v182_v47, 2 }
  0x13   :  { %279 = vset.pattern.permute.xlu0 %v311_v6  ;;  %238 = vmatprep.subr.mxu0 %v310_v2  ;;  %v38_v21 = vld [vmem:[#allocation2] sm:$0xff] }
  0x14   :  { %281 = vset.pattern.permute.xlu1 %v312_v7  ;;  %74 = vperm.xlu0 %279, %v55_v3   ;;  %v36_v25 = vld [vmem:[%s371_s1] sm:$0xf] }
  0x15   :  { %94 = vperm.xlu1 %281, %v55_v3   ;;  %239 = vmatpush3.msra.mxu0 %v51_v8  ;;  %v64_v26 = vrot.slane %v36_v25, %v63_v24  ;;  %v80_v33 = vrot.slane %v36_v25, %v79_v27  ;;  %v215_v34 = vld [vmem:[%s372_s2] ss:$0 sm:$0xff]  ;;  %v90_v35 = vrot.slane %v36_v25, %v89_v29 }
  0x16   :  { %240 = vmatprep.subr.mxu0 %v310_v2  ;;  %v100_v36 = vrot.slane %v36_v25, %v99_v31  ;;  %v216_v48 = vld [vmem:[%s374_s4] ss:$0 sm:$0xff] }
  0x17   :  { %241 = vmatpush3.msra.mxu0 %v50_v9 }
  0x18   :  { %282 = vset.pattern.permute.xlu0 %v312_v7  ;;  %242 = vmatprep.subr.mxu0 %v310_v2 }
  0x19   :  { %243 = vmatpush3.msra.mxu0 %v49_v10 }
  0x1a   :  { %244 = vmatprep.subr.mxu0 %v310_v2 }
  0x1b   :  { %245 = vmatpush3.msra.mxu0 %v48_v11 }
  0x1c   :  { %246 = vmatprep.subr.mxu0 %v310_v2 }
  0x1d   :  { %247 = vmatpush3.msra.mxu0 %v47_v12 }
  0x1e   :  { %248 = vmatprep.subr.mxu0 %v310_v2 }
  0x1f   :  { %249 = vmatpush3.msra.mxu0 %v46_v13 }
  0x20   :  { %250 = vmatprep.subr.mxu0 %v310_v2 }
  0x21   :  { %251 = vmatpush3.msra.mxu0 %v45_v14 }
  0x22   :  { %252 = vmatprep.subr.mxu0 %v310_v2 }
  0x23   :  { %253 = vmatpush3.msra.mxu0 %v44_v15 }
  0x24   :  { %254 = vmatprep.subr.mxu0 %v310_v2 }
  0x25   :  { %255 = vmatpush3.msra.mxu0 %v43_v16 }
  0x26   :  { %256 = vmatprep.subr.mxu0 %v310_v2 }
  0x27   :  { %257 = vmatpush3.msra.mxu0 %v42_v17 }
  0x28   :  { %258 = vmatprep.subr.mxu0 %v310_v2 }
  0x29   :  { %259 = vmatpush3.msra.mxu0 %v41_v18 }
  0x2a   :  { %260 = vmatprep.subr.mxu0 %v310_v2 }
  0x2b   :  { %261 = vmatpush3.msra.mxu0 %v40_v19 }
  0x2c   :  { %262 = vmatprep.subr.mxu0 %v310_v2 }
  0x2d   :  { %263 = vmatpush3.msra.mxu0 %v39_v20 }
  0x2e   :  { %264 = vmatprep.subr.mxu0 %v310_v2 }
  0x2f   :  { %265 = vmatpush3.msra.mxu0 %v38_v21 }
  0x8a   :  { %v59_v28 = vpop.permute.xlu0 %58 }
  0x8b   :  { %v85_v30 = vpop.permute.xlu1 %84  ;;  %v65_v32 = vmul.f32 %v64_v26, %v59_v28 }
  0x8c   :  { %v91_v41 = vmul.f32 %v90_v35, %v85_v30 }
  0x8d   :  { %v72_v39 = vadd.f32 %v215_v34, %v65_v32 }
  0x8f   :  { %v75_v37 = vpop.permute.xlu0 %74 }
  0x90   :  { %v95_v38 = vpop.permute.xlu1 %94  ;;  %v81_v40 = vmul.f32 %v80_v33, %v75_v37 }
  0x91   :  { %v101_v43 = vmul.f32 %v100_v36, %v95_v38 }
  0x92   :  { %v82_v42 = vadd.f32 %v81_v40, %v72_v39 }
  0x94   :  { %v92_v44 = vadd.f32 %v91_v41, %v82_v42 }
  0x96   :  { %v102_v45 = vadd.f32 %v101_v43, %v92_v44 }
  0x98   :  { %v103_v46 = vmax.f32 %v102_v45, 0.0 }
  0x9a   :  { %267 = vmatmul.mubr.f32.vlgmr.msra.gmra.mxu0 %v103_v46 }
 0x15a   :  { %v176_v49 = vpop.f32.mrf.mxu0 }
 0x15b   :  { %v177_v50 = vadd.f32 %v216_v48, %v176_v49 }
 0x15c   :  { %v268_v51 = vpop.f32.mrf.mxu0 }
 0x15d   :  { %180 = vst [vmem:[%s375_s5] sm:$0xff] %v177_v50  ;;  %v184_v52 = vsel %vm183_vm1, %v177_v50, -inf }
 0x15e   :  { %185 = vmax.xlane.f32.xlu1 %v184_v52 }
 0x1e7   :  { %v186_v53 = vpop.xlane.xlu1 %185 }
 0x1e8   :  { %vm187_vm2 = vcmp.eq.f32.partialorder %v184_v52, %v186_v53 }
 0x1e9   :  { %vm188_vm3 = vmand %vm187_vm2, %vm183_vm1 }
 0x1ea   :  { %v189_v54 = vsel %vm188_vm3, %v182_v47, 128 }
 0x1eb   :  { %v191_v55 = vshra.s32 %v189_v54, 16  ;;  %v190_v57 = vand.u32 65535, %v189_v54 }
 0x1ed   :  { %v193_v56 = vcvt.s32.f32 %v191_v55  ;;  %v192_v59 = vcvt.s32.f32 %v190_v57 }
 0x1ef   :  { %194 = vmin.xlane.f32.xlu0 %v193_v56 }
 0x278   :  { %v195_v58 = vpop.xlane.xlu0 %194 }
 0x279   :  { %vm196_vm4 = vcmp.eq.f32.partialorder %v193_v56, %v195_v58  ;;  %v201_v61 = vcvt.f32.s32 %v195_v58 }
 0x27a   :  { %v197_v60 = vsel %vm196_vm4, %v192_v59, inf }
 0x27b   :  { %198 = vmin.xlane.f32.xlu0 %v197_v60  ;;  %v202_v63 = vshll.u32 %v201_v61, 16 }
 0x304   :  { %v199_v62 = vpop.xlane.xlu0 %198 }
 0x305   :  { %v200_v0 = vcvt.f32.s32 %v199_v62 }
 0x307   :  { %v203_v1 = vadd.s32 %v202_v63, %v200_v0 }
 0x309   :  { %205 = vst.msk [vmem:[%s376_s6] sm:$0xff] %vm204_vm5, %v203_v1 }
 0x30a   :  { %214 = vsyncpa [#allocation3], 1 }

</bundles_post_ra>
